<compile_context>
chip_gen: v7x
topology: tpu7x:2x2x1
jax: 0.10.0
libtpu: 0.0.40
codegen_flags: <defaults>
</compile_context>

<pallas_src>
import jax
import jax.numpy as jnp
from jax.experimental import pallas as pl
from jax.experimental.pallas import tpu as pltpu


def _ct_in_relu_kernel(x_ref, w_ref, o_ref):
    # x_ref: (1, Cin, HW) bf16   w_ref: (C4, Cin) bf16   o_ref: (1, C4, HW) bf16
    x = x_ref[0]                          # (Cin, HW)
    w = w_ref[...]                        # (C4, Cin), kpos-major rows

    # Transposed conv (stride == kernel => pure matmul) on the MXU, f32 acc.
    # (C4, Cin) @ (Cin, HW): no operand transposes needed.
    y = jnp.dot(w, x, preferred_element_type=jnp.float32)     # (C4, HW) f32

    c4, hw = y.shape
    cout = c4 // 4

    # --- Instance-norm statistics ------------------------------------------
    # Lane (HW-axis) reductions first; y*y inline so it fuses into the reduce.
    s1 = jnp.sum(y, axis=1, keepdims=True)        # (C4, 1)  sum(y)
    s2 = jnp.sum(y * y, axis=1, keepdims=True)    # (C4, 1)  sum(y^2)

    # kpos-major rows -> per-channel combine = 4 aligned sublane-slice adds.
    g1 = s1[0:cout] + s1[cout:2 * cout] + s1[2 * cout:3 * cout] + s1[3 * cout:4 * cout]
    g2 = s2[0:cout] + s2[cout:2 * cout] + s2[2 * cout:3 * cout] + s2[3 * cout:4 * cout]

    inv_n = 1.0 / float(hw * 4)           # elements per channel = (2H)*(2W)
    mean = g1 * inv_n
    # Single-pass E[y^2]-mean^2 in f32; clamp guards the (rare) cancellation.
    var = jnp.maximum(g2 * inv_n - mean * mean, 0.0)
    scale = jax.lax.rsqrt(var + 1e-5)     # (Cout, 1) f32 (EUP, v5e-safe)
    shift = -mean * scale                 # (Cout, 1)

    # Re-broadcast per-channel scale/shift to kpos-major rows: 4 row copies.
    scale_r = jnp.concatenate([scale, scale, scale, scale], axis=0)   # (C4, 1)
    shift_r = jnp.concatenate([shift, shift, shift, shift], axis=0)   # (C4, 1)

    # --- Single-pass normalize + ReLU, bf16 lane-dense store ----------------
    o_ref[0] = jnp.maximum(y * scale_r + shift_r, 0.0).astype(o_ref.dtype)


def conv_transpose_block_forward(x, weight, skip_input, i=None):
    """x: (N, Cin, H, W) f32; weight: (Cin, Cout, 2, 2) f32 (PyTorch layout);
    skip_input: (N, Cskip, 2H, 2W) f32.  Returns (N, Cout+Cskip, 2H, 2W) f32.

    Precision knob: matmul operands and the kernel's intermediate output are
    bfloat16 (f32 accumulation / f32 stats); results differ from the f32
    PyTorch module at the ~1e-2 level by design."""
    del i  # unused (matches the PyTorch forward signature)
    n, cin, h, w = x.shape
    cout = weight.shape[1]
    hw = h * w
    c4 = cout * 4

    # Glue: NCHW -> (N, Cin, HW) is a free reshape; only the bf16 cast costs.
    x_flat = x.reshape(n, cin, hw).astype(jnp.bfloat16)
    # (Cin, Cout, kh, kw) -> kpos-major rows: (kh, kw, Cout, Cin) -> (C4, Cin).
    w_t = jnp.transpose(weight, (2, 3, 1, 0)).reshape(c4, cin).astype(jnp.bfloat16)

    # Per-grid-step VMEM: double-buffered in/out (bf16) + resident weight +
    # the single (C4, HW) f32 temporary.  Cap below v7x's 64 MiB physical.
    block_bytes = (2 * cin * hw * 2) + (c4 * cin * 2) + (2 * c4 * hw * 2) \
        + (c4 * hw * 4) + (1 << 20)
    vmem_limit = int(min(48 * 1024 * 1024, max(32 * 1024 * 1024, block_bytes)))

    cost = pl.CostEstimate(
        flops=2 * n * hw * cin * c4 + 8 * n * hw * c4,
        transcendentals=n * cout,
        bytes_accessed=x_flat.size * 2 + w_t.size * 2 + n * c4 * hw * 2,
    )

    out_flat = pl.pallas_call(
        _ct_in_relu_kernel,
        out_shape=jax.ShapeDtypeStruct((n, c4, hw), jnp.bfloat16),
        grid_spec=pltpu.PrefetchScalarGridSpec(
            num_scalar_prefetch=0,
            grid=(n,),
            in_specs=[
                pl.BlockSpec((1, cin, hw), lambda b: (b, 0, 0)),
                pl.BlockSpec((c4, cin), lambda b: (0, 0)),
            ],
            out_specs=pl.BlockSpec((1, c4, hw), lambda b: (b, 0, 0)),
        ),
        compiler_params=pltpu.CompilerParams(
            dimension_semantics=("parallel",),
            vmem_limit_bytes=vmem_limit,
        ),
        cost_estimate=cost,
    )(x_flat, w_t)

    # Epilogue glue (one pass): de-interleave kpos-major rows into NCHW and
    # upcast to f32.  (n, kh, kw, oc, h, w) -> (n, oc, h, kh, w, kw).
    t = out_flat.reshape(n, 2, 2, cout, h, w)
    out = jnp.transpose(t, (0, 3, 4, 1, 5, 2)).reshape(n, cout, 2 * h, 2 * w)
    out = out.astype(jnp.float32)

    # Channel concat with the skip connection (pure data movement -> glue).
    return jnp.concatenate((out, skip_input), axis=1)


def _reference(x, weight, skip_input):
    """Pure-JAX f32 reference of the PyTorch module (for sanity checking)."""
    n, cin, h, w = x.shape
    cout = weight.shape[1]
    y = jnp.einsum("nchw,cokl->nohkwl", x, weight)        # (n,cout,h,2,w,2)
    y = y.reshape(n, cout, 2 * h, 2 * w)
    mean = y.mean(axis=(2, 3), keepdims=True)
    var = ((y - mean) ** 2).mean(axis=(2, 3), keepdims=True)
    y = jnp.maximum((y - mean) * jax.lax.rsqrt(var + 1e-5), 0.0)
    return jnp.concatenate((y, skip_input), axis=1)


if __name__ == "__main__":
    key = jax.random.PRNGKey(0)
    k_x, k_w, k_s = jax.random.split(key, 3)

    N, CIN, COUT, H, W = 2, 4, 8, 16, 16

    x = jax.random.normal(k_x, (N, CIN, H, W), dtype=jnp.float32)
    # PyTorch ConvTranspose2d weight shape (Cin, Cout, kH, kW).
    weight = jax.random.normal(k_w, (CIN, COUT, 2, 2), dtype=jnp.float32) * 0.1
    skip = jax.random.normal(k_s, (N, COUT, 2 * H, 2 * W), dtype=jnp.float32)

    out = conv_transpose_block_forward(x, weight, skip, i=0)
    jax.block_until_ready(out)
    assert out.shape == (N, 2 * COUT, 2 * H, 2 * W), out.shape

    ref = _reference(x, weight, skip)
    max_err = float(jnp.max(jnp.abs(out - ref)))
    # bf16 MXU operands and bf16 kernel output -> loose tolerance; a layout
    # bug would show up as an O(1) error.
    assert max_err < 8e-2, f"max abs error {max_err}"

    print("KERNEL_OK")
</pallas_src>

<mosaic_0001>
module attributes {stable_mosaic.version = 11 : i64} {
  func.func @_ct_in_relu_kernel(%arg0: i32, %arg1: memref<1x4x256xbf16, #tpu.memory_space<vmem>>, %arg2: memref<32x4xbf16, #tpu.memory_space<vmem>>, %arg3: memref<1x32x256xbf16, #tpu.memory_space<vmem>>) attributes {dimension_semantics = [#tpu.dimension_semantics<parallel>], iteration_bounds = array<i64: 2>, scalar_prefetch = 0 : i64, scratch_operands = 0 : i64, tpu.core_type = #tpu.core_type<tc>, window_params = [{transform_indices = @transform_0, window_bounds = array<i64: 1, 4, 256>}, {pipeline_mode = #tpu.pipeline_mode<synchronous>, transform_indices = @transform_1, window_bounds = array<i64: 32, 4>}, {transform_indices = @transform_2, window_bounds = array<i64: 1, 32, 256>}]} {
    %c0 = arith.constant 0 : index
    %c0_0 = arith.constant 0 : index
    %c0_1 = arith.constant 0 : index
    %0 = vector.load %arg1[%c0, %c0_0, %c0_1] : memref<1x4x256xbf16, #tpu.memory_space<vmem>>, vector<1x4x256xbf16>
    %1 = vector.shape_cast %0 : vector<1x4x256xbf16> to vector<4x256xbf16>
    %c0_2 = arith.constant 0 : index
    %c0_3 = arith.constant 0 : index
    %2 = vector.load %arg2[%c0_2, %c0_3] : memref<32x4xbf16, #tpu.memory_space<vmem>>, vector<32x4xbf16>
    %cst = arith.constant dense<0.000000e+00> : vector<32x256xf32>
    %3 = tpu.matmul %2, %1, %cst {dimension_numbers = #tpu.dot_dimension_numbers<[1], [0], [0], [1], [0, 0, 1, 1], [], []>} : vector<32x4xbf16>, vector<4x256xbf16>, vector<32x256xf32> -> vector<32x256xf32>
    %cst_4 = arith.constant dense<0.000000e+00> : vector<32xf32>
    %4 = vector.multi_reduction <add>, %3, %cst_4 [1] : vector<32x256xf32> to vector<32xf32>
    %5 = vector.shape_cast %4 : vector<32xf32> to vector<32x1xf32>
    %6 = arith.mulf %3, %3 : vector<32x256xf32>
    %cst_5 = arith.constant dense<0.000000e+00> : vector<32xf32>
    %7 = vector.multi_reduction <add>, %6, %cst_5 [1] : vector<32x256xf32> to vector<32xf32>
    %8 = vector.shape_cast %7 : vector<32xf32> to vector<32x1xf32>
    %9 = vector.extract_strided_slice %5 {offsets = [0, 0], sizes = [8, 1], strides = [1, 1]} : vector<32x1xf32> to vector<8x1xf32>
    %10 = vector.extract_strided_slice %5 {offsets = [8, 0], sizes = [8, 1], strides = [1, 1]} : vector<32x1xf32> to vector<8x1xf32>
    %11 = arith.addf %9, %10 : vector<8x1xf32>
    %12 = vector.extract_strided_slice %5 {offsets = [16, 0], sizes = [8, 1], strides = [1, 1]} : vector<32x1xf32> to vector<8x1xf32>
    %13 = arith.addf %11, %12 : vector<8x1xf32>
    %14 = vector.extract_strided_slice %5 {offsets = [24, 0], sizes = [8, 1], strides = [1, 1]} : vector<32x1xf32> to vector<8x1xf32>
    %15 = arith.addf %13, %14 : vector<8x1xf32>
    %16 = vector.extract_strided_slice %8 {offsets = [0, 0], sizes = [8, 1], strides = [1, 1]} : vector<32x1xf32> to vector<8x1xf32>
    %17 = vector.extract_strided_slice %8 {offsets = [8, 0], sizes = [8, 1], strides = [1, 1]} : vector<32x1xf32> to vector<8x1xf32>
    %18 = arith.addf %16, %17 : vector<8x1xf32>
    %19 = vector.extract_strided_slice %8 {offsets = [16, 0], sizes = [8, 1], strides = [1, 1]} : vector<32x1xf32> to vector<8x1xf32>
    %20 = arith.addf %18, %19 : vector<8x1xf32>
    %21 = vector.extract_strided_slice %8 {offsets = [24, 0], sizes = [8, 1], strides = [1, 1]} : vector<32x1xf32> to vector<8x1xf32>
    %22 = arith.addf %20, %21 : vector<8x1xf32>
    %cst_6 = arith.constant 9.765625E-4 : f32
    %23 = vector.broadcast %cst_6 : f32 to vector<8x1xf32>
    %24 = arith.mulf %15, %23 : vector<8x1xf32>
    %cst_7 = arith.constant 9.765625E-4 : f32
    %25 = vector.broadcast %cst_7 : f32 to vector<8x1xf32>
    %26 = arith.mulf %22, %25 : vector<8x1xf32>
    %27 = arith.mulf %24, %24 : vector<8x1xf32>
    %28 = arith.subf %26, %27 : vector<8x1xf32>
    %cst_8 = arith.constant 0.000000e+00 : f32
    %29 = vector.broadcast %cst_8 : f32 to vector<8x1xf32>
    %30 = arith.maximumf %28, %29 : vector<8x1xf32>
    %cst_9 = arith.constant 9.99999974E-6 : f32
    %31 = vector.broadcast %cst_9 : f32 to vector<8x1xf32>
    %32 = arith.addf %30, %31 : vector<8x1xf32>
    %33 = math.rsqrt %32 : vector<8x1xf32>
    %cst_10 = arith.constant 0.000000e+00 : f32
    %34 = vector.broadcast %cst_10 : f32 to vector<8x1xf32>
    %35 = arith.subf %34, %24 : vector<8x1xf32>
    %36 = arith.mulf %35, %33 : vector<8x1xf32>
    %37 = tpu.concatenate %33, %33, %33, %33 in 0 : vector<8x1xf32>, vector<8x1xf32>, vector<8x1xf32>, vector<8x1xf32> -> vector<32x1xf32>
    %38 = tpu.concatenate %36, %36, %36, %36 in 0 : vector<8x1xf32>, vector<8x1xf32>, vector<8x1xf32>, vector<8x1xf32> -> vector<32x1xf32>
    %39 = vector.broadcast %37 : vector<32x1xf32> to vector<32x256xf32>
    %40 = arith.mulf %3, %39 : vector<32x256xf32>
    %41 = vector.broadcast %38 : vector<32x1xf32> to vector<32x256xf32>
    %42 = arith.addf %40, %41 : vector<32x256xf32>
    %cst_11 = arith.constant 0.000000e+00 : f32
    %43 = vector.broadcast %cst_11 : f32 to vector<32x256xf32>
    %44 = arith.maximumf %42, %43 : vector<32x256xf32>
    %45 = arith.truncf %44 : vector<32x256xf32> to vector<32x256xbf16>
    %c0_12 = arith.constant 0 : index
    %c0_13 = arith.constant 0 : index
    %c0_14 = arith.constant 0 : index
    %46 = vector.load %arg3[%c0_12, %c0_13, %c0_14] : memref<1x32x256xbf16, #tpu.memory_space<vmem>>, vector<1x32x256xbf16>
    %47 = vector.shape_cast %46 : vector<1x32x256xbf16> to vector<32x256xbf16>
    %48 = vector.shape_cast %45 : vector<32x256xbf16> to vector<1x32x256xbf16>
    tpu.vector_store %arg3[%c0_12, %c0_13, %c0_14], %48 {strides = array<i32>} : memref<1x32x256xbf16, #tpu.memory_space<vmem>>, vector<1x32x256xbf16>,
    return
  }
  func.func @transform_0(%arg0: i32) -> (i32, i32, i32) {
    %c0_i32 = arith.constant 0 : i32
    %c0_i32_0 = arith.constant 0 : i32
    %c0_i32_1 = arith.constant 0 : i32
    return %arg0, %c0_i32, %c0_i32_0 : i32, i32, i32
  }
  func.func @transform_1(%arg0: i32) -> (i32, i32) {
    %c0_i32 = arith.constant 0 : i32
    %c0_i32_0 = arith.constant 0 : i32
    %c0_i32_1 = arith.constant 0 : i32
    return %c0_i32, %c0_i32_0 : i32, i32
  }
  func.func @transform_2(%arg0: i32) -> (i32, i32, i32) {
    %c0_i32 = arith.constant 0 : i32
    %c0_i32_0 = arith.constant 0 : i32
    %c0_i32_1 = arith.constant 0 : i32
    return %arg0, %c0_i32, %c0_i32_0 : i32, i32, i32
  }
}

</mosaic_0001>

<bundles_post_ra>
// kernel: tpu_custom_call.1
= control target key start
LH: loop header
LB: loop body
LE: loop exit
PB: predicated region body
PF: predicated region fallthrough
CT: control target
= control target key end

     0   :  { %7 = vsyncpa [#allocation3], 0  ;;  %s705_s0 = inlined_call_operand.vmem [shape: bf16[2,4,256], index: 0, kind: input, shape index: {}]   ;;  %s706_s1 = inlined_call_operand.vmem [shape: bf16[32,4], index: 1, kind: input, shape index: {}]   ;;  %s707_s2 = inlined_call_operand.hbm [shape: bf16[2,32,256], index: 2, kind: output, shape index: {}]  }
   0x1   :  { %9 = vsyncpa [#allocation3 + $0x1], 0  ;;  %s580_s9 = smov 0   ;;  %s582_s10 = smov 0  }
   0x2   :  { %s584_s11 = smov 0   ;;  %s586_s12 = smov 0  }
   0x3 LB: > { %s601_s13 = sadd.s32 4294967295, %s559_s12   ;;  %s419_s14 = sadd.s32 4294967294, %s559_s12   ;;  %s559_s12 = sphi %s586_s12, %s713_s12   ;;  %s555_s11 = sphi %s584_s11, %s712_s11   ;;  %s551_s10 = sphi %s582_s10, %s711_s10   ;;  %s547_s9 = sphi %s580_s9, %s710_s9  }
   0x4   : > { %s605_s15 = sadd.s32 1, %s559_s12   ;;  %s69_s16 = sadd.s32 1, %s555_s11 }
   0x5   : > { %s66_s17 = ssub.s32 %s559_s12, %s605_s15  ;;  %p79_p0 = scmp.ne.s32.totalorder %s555_s11, %s551_s10 }
   0x6   : > { %p67_p1 = scmp.eq.s32.totalorder %s66_s17, 0  ;;  %p80_p2 = scmp.eq.s32.totalorder %s601_s13, 1 }
   0x7   : > { %p85_p3 = scmp.ne.s32.totalorder %s551_s10, %s547_s9  ;;  %p86_p4 = scmp.eq.s32.totalorder %s419_s14, 1 }
   0x8   : > { %s616_s18 = scalar_select %p67_p1, %s555_s11, %s69_s16  }
   0x9   : > { %p618_p5 = por %p80_p2, %p79_p0  ;;  %p622_p6 = por %p86_p4, %p85_p3 }
   0xa   : > { %p422_p7 = scmp.ge.s32.totalorder %s559_s12, 1  ;;  %p115_p8 = scmp.lt.s32.totalorder %s559_s12, 3 }
   0xc   : > { %p116_p9 = pnand %p422_p7, %p115_p8 }
   0xd   : > { %p137_p10 = scmp.lt.s32.totalorder (!%p116_p9), %s601_s13, 1  ;;  %v561_v0 = vmov (!%p116_p9), 0   ;;  %vm174_vm0 = vcmask (!%p116_p9), 1041408   ;;  %v493_v4 = vld [vmem:[%s706_s1] sm:$0xff] (!%p116_p9)   ;;  %v494_v5 = vld [vmem:[%s706_s1 + $0x8] sm:$0xff] (!%p116_p9)   ;;  %vm167_vm1 = vcmask (!%p116_p9), 31744  }
   0xe   : > { %119 = sbr.rel (%p116_p9) target bundleno = 576 (0x240), region = 28  ;;  %213 = vmatprep.mubr.bf16.mxu0 (!%p116_p9), %v561_v0  ;;  %223 = vmatprep.mubr.bf16.mxu1 (!%p116_p9), %v561_v0  ;;  %s134_s30 = sand.u32 (!%p116_p9), 1, %s551_s10  }
   0xf   : > { %491 = vset.pattern.permute.xlu0 (!%p116_p9), %v561_v0  ;;  %492 = vset.pattern.permute.xlu1 (!%p116_p9), %v561_v0  ;;  %s423_s3 = sshll.u32 (!%p116_p9), %s134_s30, 5  ;;  %s446_s4 = sshll.u32 (!%p116_p9), %s601_s13, 9 }
  0x10   : > { %s136_s5 = scalar_lea.vmem (!%p116_p9), [#allocation2], %s423_s3  ;;  %s658_s14 = scalar_lea.hbm (!%p116_p9), %s707_s2, %s446_s4 }
  0x11   : > { %s357_s6 = sshll.u32 (!%p116_p9), %s136_s5, 4  ;;  %s562_s17 = smov (!%p116_p9), [#allocation2]   ;;  %s660_s6 = int_to_ptr.vmem [resolvable:$true] %s357_s6 }
  0x12   : > { %s497_s16 = scalar_lea.vmem (!%p116_p9), %s660_s6, 512 }
  0x13   : > { %p498_p11 = scmp.ne.s32.totalorder (!%p116_p9), %s660_s6, %s497_s16 }
  0x15   : > { %s138_s21 = scalar_select %p137_p10, %s601_s13, 1 }
  0x16   : > { %s664_s13 = scalar_lea.sflag [#allocation3], %s134_s30  ;;  %p499_p12 = pnand %p498_p11, %p618_p5 }
  0x17   : > { %s441_s22 = sshll.u32 %s138_s21, 2  ;;  %s501_s21 = sshll.u32 %s562_s17, 4  ;;  %s502_s21 = int_to_ptr.vmem [resolvable:$false] %s501_s21 }
  0x18   : > { %s141_s25 = scalar_lea.vmem %s705_s0, %s441_s22  ;;  %p500_p13 = pneg %p499_p12 }
  0x19   : > { %v428_v1 = vld.sshfl [vmem:[%s141_s25] sm:$0x33 pattern:$0x76325410]  ;;  %s503_s22 = scalar_lea.vmem %s502_s21, 1024  ;;  %p504_p0 = scmp.lt.s32.totalorder %s660_s6, %s502_s21 }
  0x1a   : > { %v166_v2 = vcombine.high %v428_v1, %v428_v1  ;;  %v176_v3 = vsel %vm174_vm0, %v428_v1, 0  ;;  %p505_p1 = scmp.lt.s32.totalorder %s503_s22, %s497_s16 }
  0x1c   : > { %429 = vmatprep.subr.msk.bf16.mxu0 %vm174_vm0, %v166_v2  ;;  %447 = vmatprep.subr.msk.bf16.mxu1 %vm174_vm0, %v166_v2  ;;  %p506_p2 = por %p505_p1, %p504_p0 }
  0x1d   : > { %182 = vmatpush1.bf16.msra.mxu0 %v176_v3  ;;  %448 = vmatpush1.bf16.msra.mxu1 %v176_v3 }
  0x1e   : > { %p507_p3 = pnand %p506_p2, %p500_p13 }
  0x20   : > { %430 = vmatmul.mubr.msk.bf16.vlgmr.msra.gmra.mrb[0].mxu0 %vm167_vm1, %v493_v4  ;;  %431 = vmatmul.mubr.msk.bf16.vlgmr.msra.gmra.mrb[0].mxu1 %vm167_vm1, %v494_v5 }
  0xf3   : > { %v215_v6 = vpop.f32.mrb[0].mxu0  ;;  %v639_v7 = vpop.f32.mrb[0].mxu1 }
  0xf4   : > { %v217_v8 = vpop.f32.mrb[1].mxu0  ;;  %v641_v9 = vpop.f32.mrb[1].mxu1  ;;  %v246_v10 = vmul.f32 %v215_v6, %v215_v6  ;;  %v250_v11 = vmul.f32 %v639_v7, %v639_v7 }
  0xf5   : > { %v219_v12 = vpop.f32.mrb[2].mxu0  ;;  %v229_v13 = vpop.f32.mrb[2].mxu1  ;;  %v240_v14 = vadd.f32 %v641_v9, %v639_v7  ;;  %v234_v15 = vadd.f32 %v217_v8, %v215_v6  ;;  %v247_v16 = vmul.f32 %v217_v8, %v217_v8  ;;  %v251_v17 = vmul.f32 %v641_v9, %v641_v9 }
  0xf6   : > { %v221_v18 = vpop.f32.mrb[3].mxu0  ;;  %v231_v19 = vpop.f32.mrb[3].mxu1  ;;  %v248_v20 = vmul.f32 %v219_v12, %v219_v12  ;;  %v252_v21 = vmul.f32 %v229_v13, %v229_v13 }
  0xf7   : > { %v249_v22 = vmul.f32 %v221_v18, %v221_v18  ;;  %v253_v23 = vmul.f32 %v231_v19, %v231_v19  ;;  %241 = vadd.xlane.f32.xlu1 %v240_v14  ;;  %235 = vadd.xlane.f32.xlu0 %v234_v15  ;;  %v254_v24 = vadd.f32 %v247_v16, %v246_v10 }
  0xf8   : > { %v237_v25 = vadd.f32 %v221_v18, %v219_v12  ;;  %v243_v26 = vadd.f32 %v231_v19, %v229_v13  ;;  %v260_v27 = vadd.f32 %v251_v17, %v250_v11 }
  0xf9   : > { %v257_v28 = vadd.f32 %v249_v22, %v248_v20  ;;  %v263_v29 = vadd.f32 %v253_v23, %v252_v21 }
  0xfb   : > { %255 = vadd.xlane.f32.xlu1 %v254_v24  ;;  %238 = vadd.xlane.f32.xlu0 %v237_v25 }
  0xff   : > { %244 = vadd.xlane.f32.xlu1 %v243_v26  ;;  %258 = vadd.xlane.f32.xlu0 %v257_v28 }
 0x103   : > { %264 = vadd.xlane.f32.xlu1 %v263_v29  ;;  %261 = vadd.xlane.f32.xlu0 %v260_v27 }
 0x184   : > { %v242_v30 = vpop.xlane.xlu1 %241  ;;  %v236_v31 = vpop.xlane.xlu0 %235 }
 0x188   : > { %v256_v32 = vpop.xlane.xlu1 %255  ;;  %v239_v33 = vpop.xlane.xlu0 %238 }
 0x189   : > { %v266_v34 = vadd.f32 %v239_v33, %v236_v31 }
 0x18b   : > { %v267_v35 = vadd.f32 %v266_v34, %v242_v30 }
 0x18c   : > { %v245_v36 = vpop.xlane.xlu1 %244  ;;  %v259_v37 = vpop.xlane.xlu0 %258 }
 0x18d   : > { %v268_v38 = vadd.f32 %v267_v35, %v245_v36  ;;  %v269_v39 = vadd.f32 %v259_v37, %v256_v32 }
 0x18f   : > { %v272_v41 = vmul.f32 0.0009765625, %v268_v38 }
 0x190   : > { %v262_v40 = vpop.xlane.xlu0 %261  ;;  %v265_v43 = vpop.xlane.xlu1 %264 }
 0x191   : > { %v270_v42 = vadd.f32 %v269_v39, %v262_v40  ;;  %v274_v45 = vmul.f32 %v272_v41, %v272_v41  ;;  %v279_v50 = vsub.f32 0.0, %v272_v41 }
 0x193   : > { %v271_v44 = vadd.f32 %v270_v42, %v265_v43 }
 0x195   : > { %v273_v46 = vmul.f32 0.0009765625, %v271_v44 }
 0x197   : > { %v275_v47 = vsub.f32 %v273_v46, %v274_v45 }
 0x199   : > { %v276_v48 = vmax.f32 %v275_v47, 0.0 }
 0x19b   : > { %v277_v49 = vadd.f32 1e-05, %v276_v48 }
 0x19d   : > { %495 = vrsqrt.f32 %v277_v49 }
 0x1a7   : > { %v496_v51 = vpop.eup %495 }
 0x1a8   : > { %283 = vperm.xlu0 %491, %v496_v51   ;;  %v280_v52 = vmul.f32 %v496_v51, %v279_v50 }
 0x1aa   : > { %296 = vperm.xlu1 %492, %v280_v52  }
 0x227   : > { %v284_v53 = vpop.permute.xlu0 %283 }
 0x228   : > { %v286_v54 = vmul.f32 %v284_v53, %v215_v6  ;;  %v287_v55 = vmul.f32 %v284_v53, %v217_v8  ;;  %v288_v56 = vmul.f32 %v284_v53, %v219_v12  ;;  %v289_v57 = vmul.f32 %v284_v53, %v221_v18 }
 0x229   : > { %v290_v58 = vmul.f32 %v284_v53, %v639_v7  ;;  %v291_v59 = vmul.f32 %v284_v53, %v641_v9  ;;  %v292_v60 = vmul.f32 %v284_v53, %v229_v13  ;;  %v293_v61 = vmul.f32 %v284_v53, %v231_v19  ;;  %v297_v62 = vpop.permute.xlu1 %296 }
 0x22a   : > { %v299_v63 = vadd.f32 %v297_v62, %v286_v54  ;;  %v300_v0 = vadd.f32 %v297_v62, %v287_v55  ;;  %v301_v1 = vadd.f32 %v297_v62, %v288_v56  ;;  %v302_v2 = vadd.f32 %v297_v62, %v289_v57 }
 0x22b   : > { %v303_v3 = vadd.f32 %v297_v62, %v290_v58  ;;  %v304_v4 = vadd.f32 %v297_v62, %v291_v59  ;;  %v305_v5 = vadd.f32 %v297_v62, %v292_v60  ;;  %v306_v10 = vadd.f32 %v297_v62, %v293_v61 }
 0x22c   : > { %v307_v6 = vmax.f32 %v299_v63, 0.0  ;;  %v308_v8 = vmax.f32 %v300_v0, 0.0  ;;  %v309_v11 = vmax.f32 %v301_v1, 0.0  ;;  %v310_v7 = vmax.f32 %v302_v2, 0.0 }
 0x22d   : > { %v311_v9 = vmax.f32 %v303_v3, 0.0  ;;  %v312_v12 = vmax.f32 %v304_v4, 0.0  ;;  %v313_v13 = vmax.f32 %v305_v5, 0.0  ;;  %v314_v14 = vmax.f32 %v306_v10, 0.0 }
 0x22e   : > { %v442_v15 = vpack.c.bf16 %v308_v8, %v307_v6  ;;  %v443_v16 = vpack.c.bf16 %v310_v7, %v309_v11 }
 0x22f   : > { %v444_v17 = vpack.c.bf16 %v312_v12, %v311_v9  ;;  %v445_v18 = vpack.c.bf16 %v314_v14, %v313_v13 }
 0x230   : > { %339 = vst [vmem:[%s136_s5] sm:$0xff] %v442_v15  ;;  %340 = vst [vmem:[%s136_s5 + $0x8] sm:$0xff] %v443_v16 }
 0x231   : > { %341 = vst [vmem:[%s136_s5 + $0x10] sm:$0xff] %v444_v17  ;;  %342 = vst [vmem:[%s136_s5 + $0x18] sm:$0xff] %v445_v18 }
 0x232   : > { %510 = shalt.err (!%p507_p3)
}
 0x233   : > { %s511_s23 = scalar_lea.hbm %s658_s14, 512  ;;  %s515_s26 = scalar_lea.hbm %s707_s2, 1024 }
 0x234   : > { %p512_p4 = scmp.ne.s32.totalorder %s658_s14, %s511_s23  ;;  %p516_p9 = scmp.lt.u32.totalorder %s658_s14, %s707_s2 }
 0x235   : > { %p517_p10 = scmp.lt.u32.totalorder %s515_s26, %s511_s23  ;;  %p519_p12 = scmp.lt.u32.totalorder %s511_s23, %s658_s14 }
 0x236   : > { %p513_p7 = pnand %p512_p4, %p618_p5 }
 0x237   : > { %p518_p11 = por %p517_p10, %p516_p9 }
 0x238   : > { %p514_p8 = pneg %p513_p7 }
 0x239   : > { %p520_p13 = por %p519_p12, %p518_p11 }
 0x23b   : > { %p521_p0 = pnand %p520_p13, %p514_p8 }
 0x23d   : > { %524 = shalt.err (!%p521_p0)
}
 0x23e   : > { %s563_s29 = smov 128   ;;  %s564_s30 = smov 8  }
 0x23f   : > { %449 = dma.vmem_to_hbm [thread:$0]  (%p618_p5), %s660_s6, 512, %s658_s14, %s664_s13, %s563_s29, %s563_s29, %s564_s30  }
 0x240 PF: > { %p455_p1 = scmp.ge.s32.totalorder %s559_s12, 2  ;;  %s372_s3 = sand.u32 1, %s547_s9  }
 0x241   : > { %s373_s4 = scalar_lea.sflag [#allocation3], %s372_s3 }
 0x242   : > { %p452_p2 = pnand %p455_p1, %p622_p6 }
 0x244   : > { %542 = dma.done.wait (!%p452_p2), %s373_s4, 512  }
 0x245   : > { %544 = vsyncadd (!%p452_p2), %s373_s4, 4294966784  ;;  %p12_p3 = scmp.ge.s32.totalorder %s605_s15, 4   ;;  %s710_s9 = smov %s551_s10 }
 0x246   : > { %s711_s10 = smov %s555_s11  ;;  %s712_s11 = smov %s616_s18 }
 0x247   : > { %s713_s12 = smov %s605_s15  ;;  %14 = sbr.rel (!%p12_p3) target bundleno = 3 (0x3), region = 63 }
 0x24e   :  { %378 = vsyncpa [#allocation3], 1 }
 0x24f   :  { %380 = vsyncpa [#allocation3 + $0x1], 1 }

</bundles_post_ra>
